<compile_context>
chip_gen: v7x
topology: tpu7x:2x2x1
jax: 0.10.0
libtpu: 0.0.40
codegen_flags: <defaults>
</compile_context>

<pallas_src>
import math

import jax
import jax.numpy as jnp
from jax.experimental import pallas as pl
from jax.experimental.pallas import tpu as pltpu

_LANE = 128
_SQRT2 = math.sqrt(2.0)
_PI_OVER_4 = math.pi / 4.0
_MIB = 1024 * 1024


def _sin_plus_cos_kernel(x_ref, o_ref):
    # sin(x) + cos(x) == sqrt(2) * sin(x + pi/4): one sin polynomial, not two.
    x = x_ref[...].astype(jnp.float32)
    o_ref[...] = (_SQRT2 * jnp.sin(x + _PI_OVER_4)).astype(o_ref.dtype)


def _min_sublane_multiple(dtype) -> int:
    # f32 -> 8, bf16/f16 -> 16, 1-byte dtypes -> 32.
    itemsize = jnp.dtype(dtype).itemsize
    return max(8, 32 // itemsize)


def _chip_params():
    """(tensorcores_per_device, target_block_bytes) for the local TPU."""
    kind = ""
    try:
        kind = jax.devices()[0].device_kind.lower()
    except Exception:
        pass
    if "v7" in kind or "7x" in kind:
        return 2, 8 * _MIB            # v7x: 2 TCs/chip, 3.2 TB/s HBM
    if "v4" in kind or "v5p" in kind:
        return 2, 4 * _MIB            # megacore parts: 2 TCs per device
    # v5e / v6e / unknown: single TensorCore, ~4 MiB blocks
    return 1, 4 * _MIB


def _sin_plus_cos_2d(x2d: jax.Array) -> jax.Array:
    """Run the Pallas kernel on a (rows, 128) lane-dense slab."""
    rows, lane = x2d.shape
    dtype = x2d.dtype
    itemsize = jnp.dtype(dtype).itemsize
    mult = _min_sublane_multiple(dtype)
    num_tc, target_block_bytes = _chip_params()

    # Target block rows (multiple of the sublane tile), generation-dependent.
    target_rows = max(mult, (target_block_bytes // (lane * itemsize)) // mult * mult)

    if num_tc > 1:
        # >= 2 grid steps per TensorCore so per-core double-buffering engages.
        per_core_rows = pl.cdiv(rows, 2 * num_tc)
        per_core_rows = pl.cdiv(per_core_rows, mult) * mult
        target_rows = max(mult, min(target_rows, per_core_rows))

    if rows <= target_rows:
        block_rows = rows             # single full-extent block (always legal)
    else:
        block_rows = target_rows      # sublane-multiple; partial last block masked

    grid = (pl.cdiv(rows, block_rows),)

    # 2 arrays (in + out) x 2 pipeline buffers, plus headroom.  Explicit so
    # 4 MiB blocks don't hit v5e's 16 MiB default; capped below v7x's 64 MiB/TC.
    block_bytes = block_rows * lane * itemsize
    vmem_limit = int(min(48 * _MIB, max(16 * _MIB, 4 * block_bytes + 4 * _MIB)))

    n_elems = rows * lane
    cost = pl.CostEstimate(
        flops=20 * n_elems,
        transcendentals=n_elems,
        bytes_accessed=2 * n_elems * itemsize,
    )

    return pl.pallas_call(
        _sin_plus_cos_kernel,
        out_shape=jax.ShapeDtypeStruct((rows, lane), dtype),
        grid_spec=pltpu.PrefetchScalarGridSpec(
            num_scalar_prefetch=0,
            grid=grid,
            in_specs=[pl.BlockSpec((block_rows, lane), lambda i: (i, 0))],
            out_specs=pl.BlockSpec((block_rows, lane), lambda i: (i, 0)),
        ),
        compiler_params=pltpu.CompilerParams(
            dimension_semantics=("parallel",),
            vmem_limit_bytes=vmem_limit,
        ),
        cost_estimate=cost,
    )(x2d)


def sin_plus_cos(x: jax.Array) -> jax.Array:
    """Elementwise sin(x) + cos(x) via a Pallas TPU kernel (float dtypes)."""
    orig_shape = x.shape
    n = x.size
    if n == 0:
        return x

    x_flat = x.reshape(-1)
    rem = n % _LANE
    if rem:
        # Pad once (<128 elems) to a lane multiple; sin/cos of the zero pad is
        # finite and sliced off afterwards.  One copy per side instead of the
        # old slice + concatenate full-array passes.
        x_flat = jnp.pad(x_flat, (0, _LANE - rem))

    rows = x_flat.size // _LANE
    out_flat = _sin_plus_cos_2d(x_flat.reshape(rows, _LANE)).reshape(-1)
    if rem:
        out_flat = out_flat[:n]
    return out_flat.reshape(orig_shape)


if __name__ == "__main__":
    key = jax.random.PRNGKey(0)
    # NCHW-style input consistent with a conv-activation context.
    x = jax.random.normal(key, (2, 4, 16, 16), dtype=jnp.float32)

    y = sin_plus_cos(x)
    jax.block_until_ready(y)

    y_ref = jnp.sin(x) + jnp.cos(x)
    assert y.shape == x.shape and y.dtype == x.dtype
    assert jnp.allclose(y, y_ref, atol=1e-5, rtol=1e-5)

    # Ragged (non-128-multiple) path exercises the pad-once / slice-once fast path.
    x2 = jax.random.normal(jax.random.PRNGKey(1), (3, 37), dtype=jnp.float32)
    y2 = sin_plus_cos(x2)
    jax.block_until_ready(y2)
    assert y2.shape == x2.shape and y2.dtype == x2.dtype
    assert jnp.allclose(y2, jnp.sin(x2) + jnp.cos(x2), atol=1e-5, rtol=1e-5)

    print("KERNEL_OK")
</pallas_src>

<mosaic_0001>
module attributes {stable_mosaic.version = 11 : i64} {
  func.func @_sin_plus_cos_kernel(%arg0: i32, %arg1: memref<16x128xf32, #tpu.memory_space<vmem>>, %arg2: memref<16x128xf32, #tpu.memory_space<vmem>>) attributes {dimension_semantics = [#tpu.dimension_semantics<parallel>], iteration_bounds = array<i64: 1>, scalar_prefetch = 0 : i64, scratch_operands = 0 : i64, tpu.core_type = #tpu.core_type<tc>, window_params = [{transform_indices = @transform_0, window_bounds = array<i64: 16, 128>}, {transform_indices = @transform_1, window_bounds = array<i64: 16, 128>}]} {
    %c0 = arith.constant 0 : index
    %c0_0 = arith.constant 0 : index
    %0 = vector.load %arg1[%c0, %c0_0] : memref<16x128xf32, #tpu.memory_space<vmem>>, vector<16x128xf32>
    %cst = arith.constant 0.785398185 : f32
    %1 = vector.broadcast %cst : f32 to vector<16x128xf32>
    %2 = arith.addf %0, %1 : vector<16x128xf32>
    %3 = math.sin %2 : vector<16x128xf32>
    %cst_1 = arith.constant 1.41421354 : f32
    %4 = vector.broadcast %cst_1 : f32 to vector<16x128xf32>
    %5 = arith.mulf %4, %3 : vector<16x128xf32>
    %c0_2 = arith.constant 0 : index
    %c0_3 = arith.constant 0 : index
    %6 = vector.load %arg2[%c0_2, %c0_3] : memref<16x128xf32, #tpu.memory_space<vmem>>, vector<16x128xf32>
    tpu.vector_store %arg2[%c0_2, %c0_3], %5 {strides = array<i32>} : memref<16x128xf32, #tpu.memory_space<vmem>>, vector<16x128xf32>,
    return
  }
  func.func @transform_0(%arg0: i32) -> (i32, i32) {
    %c0_i32 = arith.constant 0 : i32
    %c0_i32_0 = arith.constant 0 : i32
    return %arg0, %c0_i32 : i32, i32
  }
  func.func @transform_1(%arg0: i32) -> (i32, i32) {
    %c0_i32 = arith.constant 0 : i32
    %c0_i32_0 = arith.constant 0 : i32
    return %arg0, %c0_i32 : i32, i32
  }
}

</mosaic_0001>

<bundles_post_ra>
// kernel: tpu_custom_call.1
= control target key start
LH: loop header
LB: loop body
LE: loop exit
PB: predicated region body
PF: predicated region fallthrough
CT: control target
= control target key end

     0   :  { %6 = vsyncpa [#allocation3], 0  ;;  %s458_s0 = inlined_call_operand.hbm [shape: f32[16,128], index: 0, kind: input, shape index: {}]   ;;  %s459_s1 = inlined_call_operand.hbm [shape: f32[16,128], index: 1, kind: output, shape index: {}]  }
   0x1   :  { %7 = vsyncpa [#allocation4], 0  ;;  %s338_s6 = smov [#allocation2]   ;;  %s290_s10 = scalar_lea.hbm %s458_s0, 256 }
   0x2   :  { %s13_s7 = sshll.u32 %s338_s6, 4  ;;  %p291_p0 = scmp.ne.s32.totalorder %s458_s0, %s290_s10  ;;  %s14_s7 = int_to_ptr.vmem [resolvable:$true] %s13_s7 }
   0x3   :  { %p294_p1 = scmp.lt.u32.totalorder %s290_s10, %s458_s0 }
   0x5   :  { %p296_p2 = pnand %p294_p1, %p291_p0 }
   0x7   :  { %299 = shalt.err (!%p296_p2)
}
   0x8   :  { %s300_s15 = scalar_lea.vmem %s14_s7, 256  ;;  %p305_p4 = scmp.lt.s32.totalorder %s14_s7, %s14_s7 }
   0x9   :  { %p301_p3 = scmp.ne.s32.totalorder %s14_s7, %s300_s15  ;;  %p306_p5 = scmp.lt.s32.totalorder %s300_s15, %s300_s15 }
   0xb   :  { %p307_p6 = por %p306_p5, %p305_p4 }
   0xd   :  { %p308_p7 = pnand %p307_p6, %p301_p3 }
   0xf   :  { %311 = shalt.err (!%p308_p7)
}
  0x10   :  { %s339_s16 = smov 128   ;;  %s340_s17 = smov 8  }
  0x11   :  { %19 = dma.hbm_to_vmem [thread:$0]  %s458_s0, 256, %s14_s7, [#allocation3], %s339_s16, %s339_s16, %s340_s17  }
  0x12   :  { %334 = dma.done.wait [#allocation3], 256  }
  0x13   :  { %335 = vsyncadd [#allocation3], 4294967040  ;;  %v23_v0 = vld [vmem:[#allocation2] sm:$0xff]  ;;  %v24_v1 = vld [vmem:[#allocation2 + $0x8] sm:$0xff]  ;;  %v341_v26 = vmov 683565275  }
  0x14   :  { %v373_v2 = vadd.f32 0.7853982, %v23_v0  ;;  %v375_v3 = vadd.f32 0.7853982, %v24_v1  ;;  %v342_v28 = vmov 2475754826  }
  0x15   :  { %v343_v30 = vmov 2131351028   ;;  %v344_v32 = vmov 2102212464   ;;  %v345_v34 = vmov 920167782  }
  0x16   :  { %v27_v4 = vand.u32 2147483647, %v373_v2  ;;  %v30_v5 = vand.u32 2139095040, %v373_v2  ;;  %v131_v6 = vand.u32 2147483647, %v375_v3  ;;  %v134_v7 = vand.u32 2139095040, %v375_v3 }
  0x17   :  { %v346_v42 = vmov 1326507024   ;;  %vm29_vm14 = vcmp.lt.s32.totalorder %v373_v2, 0  ;;  %s347_s0 = smov [#allocation5]  }
  0x18   :  { %v31_v8 = vshrl.u32 %v30_v5, 23  ;;  %v34_v9 = vand.u32 8388607, %v27_v4  ;;  %v135_v10 = vshrl.u32 %v134_v7, 23  ;;  %v138_v11 = vand.u32 8388607, %v131_v6 }
  0x19   :  { %vm28_vm15 = vcmp.le.f32.partialorder %v27_v4, 0.7853982  ;;  %s244_s20 = sshll.u32 %s347_s0, 4  ;;  %s245_s20 = int_to_ptr.vmem [resolvable:$true] %s244_s20 }
  0x1a   :  { %v256_v12 = vadd.s32 4294967169, %v31_v8  ;;  %v260_v13 = vadd.s32 4294967169, %v135_v10  ;;  %v35_v15 = vor.u32 8388608, %v34_v9  ;;  %v139_v16 = vor.u32 8388608, %v138_v11  ;;  %s312_s21 = scalar_lea.vmem %s245_s20, 256  ;;  %p317_p9 = scmp.lt.s32.totalorder %s245_s20, %s245_s20 }
  0x1b   :  { %p313_p8 = scmp.ne.s32.totalorder %s245_s20, %s312_s21  ;;  %p318_p10 = scmp.lt.s32.totalorder %s312_s21, %s312_s21 }
  0x1c   :  { %v37_v14 = vadd.s32 1, %v256_v12  ;;  %v141_v17 = vadd.s32 1, %v260_v13  ;;  %v385_v22 = vshll.u32 %v35_v15, 8  ;;  %v387_v24 = vshll.u32 %v139_v16, 8 }
  0x1d   :  { %p319_p11 = por %p318_p10, %p317_p9 }
  0x1e   :  { %vm38_vm0 = vcmp.gt.s32.totalorder %v37_v14, 0  ;;  %vm142_vm1 = vcmp.gt.s32.totalorder %v141_v17, 0 }
  0x1f   :  { %v39_v18 = vsel %vm38_vm0, %v37_v14, 0  ;;  %v143_v21 = vsel %vm142_vm1, %v141_v17, 0  ;;  %vm133_vm0 = vcmp.lt.s32.totalorder %v375_v3, 0  ;;  %vm132_vm1 = vcmp.le.f32.partialorder %v131_v6, 0.7853982  ;;  %p320_p12 = pnand %p319_p11, %p313_p8 }
  0x20   :  { %v40_v19 = vshrl.u32 %v39_v18, 5  ;;  %v41_v20 = vand.u32 31, %v39_v18  ;;  %v145_v23 = vand.u32 31, %v143_v21  ;;  %v389_v36 = vshrl.u32 %v143_v21, 5 }
  0x22   :  { %v42_v25 = vsub.s32 32, %v41_v20  ;;  %v44_v27 = vshll.u32 %v341_v26, %v41_v20  ;;  %v47_v29 = vshll.u32 %v342_v28, %v41_v20  ;;  %v50_v31 = vshll.u32 %v343_v30, %v41_v20 }
  0x23   :  { %v53_v33 = vshll.u32 %v344_v32, %v41_v20  ;;  %v56_v35 = vshll.u32 %v345_v34, %v41_v20  ;;  %vm59_vm2 = vcmp.lt.s32.totalorder %v40_v19, 1  ;;  %vm60_vm3 = vcmp.lt.s32.totalorder %v40_v19, 2 }
  0x24   :  { %v43_v37 = vshrl.u32 %v341_v26, %v42_v25  ;;  %v45_v38 = vshrl.u32 %v342_v28, %v42_v25  ;;  %v48_v39 = vshrl.u32 %v343_v30, %v42_v25  ;;  %v51_v40 = vshrl.u32 %v344_v32, %v42_v25 }
  0x25   :  { %v54_v41 = vshrl.u32 %v345_v34, %v42_v25  ;;  %v57_v43 = vshrl.u32 %v346_v42, %v42_v25  ;;  %vm62_vm4 = vcmp.lt.s32.totalorder %v40_v19, 4  ;;  %v146_v47 = vsub.s32 32, %v145_v23 }
  0x26   :  { %v46_v44 = vor.u32 %v45_v38, %v44_v27  ;;  %v49_v45 = vor.u32 %v48_v39, %v47_v29  ;;  %v52_v46 = vor.u32 %v51_v40, %v50_v31  ;;  %vm61_vm5 = vcmp.lt.s32.totalorder %v40_v19, 3 }
  0x27   :  { %v55_v48 = vor.u32 %v54_v41, %v53_v33  ;;  %v58_v49 = vor.u32 %v57_v43, %v56_v35  ;;  %v148_v50 = vshll.u32 %v341_v26, %v145_v23  ;;  %v151_v58 = vshll.u32 %v342_v28, %v145_v23 }
  0x28   :  { %v63_v51 = vsel %vm59_vm2, %v43_v37, %v46_v44  ;;  %v64_v52 = vsel %vm62_vm4, %v52_v46, 2102212464  ;;  %v67_v53 = vsel %vm59_vm2, %v46_v44, %v49_v45  ;;  %v71_v54 = vsel %vm59_vm2, %v49_v45, %v52_v46 }
  0x29   :  { %v65_v55 = vsel %vm61_vm5, %v49_v45, %v64_v52  ;;  %v68_v56 = vsel %vm62_vm4, %v55_v48, 920167782  ;;  %v72_v57 = vsel %vm62_vm4, %v58_v49, 1326507024  ;;  %v147_v61 = vshrl.u32 %v341_v26, %v146_v47 }
  0x2a   :  { %v69_v59 = vsel %vm61_vm5, %v52_v46, %v68_v56  ;;  %v73_v60 = vsel %vm61_vm5, %v55_v48, %v72_v57  ;;  %v149_v62 = vshrl.u32 %v342_v28, %v146_v47  ;;  %v66_v63 = vsel %vm60_vm3, %v63_v51, %v65_v55 }
  0x2b   :  { %v70_v0 = vsel %vm60_vm3, %v67_v53, %v69_v59  ;;  %v74_v1 = vsel %vm60_vm3, %v71_v54, %v73_v60  ;;  %v152_v5 = vshrl.u32 %v343_v30, %v146_v47  ;;  %v154_v13 = vshll.u32 %v343_v30, %v145_v23 }
  0x2c   :  { %v398_v7 = vmul.u32.u64.low %v385_v22, %v74_v1  ;;  %v399_v8 = vmul.u32.u64.high %v385_v22, %v74_v1, %v398_v7  ;;  %v402_v9 = vmul.u32.u64.low %v385_v22, %v70_v0  ;;  %v403_v10 = vmul.u32.u64.high %v385_v22, %v70_v0, %v402_v9 }
  0x2d   :  { %v150_v11 = vor.u32 %v149_v62, %v148_v50  ;;  %v153_v12 = vor.u32 %v152_v5, %v151_v58  ;;  %v155_v14 = vshrl.u32 %v344_v32, %v146_v47  ;;  %v157_v15 = vshll.u32 %v344_v32, %v145_v23 }
  0x2e   :  { %v158_v16 = vshrl.u32 %v345_v34, %v146_v47  ;;  %v160_v17 = vshll.u32 %v345_v34, %v145_v23  ;;  %v161_v18 = vshrl.u32 %v346_v42, %v146_v47  ;;  %v82_v19 = vmul.u32 %v385_v22, %v66_v63 }
  0x2f   :  { %v156_v20 = vor.u32 %v155_v14, %v154_v13  ;;  %vm163_vm6 = vcmp.lt.s32.totalorder %v389_v36, 1  ;;  %vm164_vm7 = vcmp.lt.s32.totalorder %v389_v36, 2  ;;  %vm84_vm8 = vc.u32 %v399_v8, %v402_v9 }
  0x30   :  { %v85_v21 = vadd.s32 1, %v403_v10  ;;  %v159_v25 = vor.u32 %v158_v16, %v157_v15  ;;  %vm165_vm9 = vcmp.lt.s32.totalorder %v389_v36, 3  ;;  %v162_v26 = vor.u32 %v161_v18, %v160_v17 }
  0x31   :  { %vm166_vm10 = vcmp.lt.s32.totalorder %v389_v36, 4  ;;  %v167_v27 = vsel %vm163_vm6, %v147_v61, %v150_v11  ;;  %v171_v23 = vsel %vm163_vm6, %v150_v11, %v153_v12  ;;  %v175_v30 = vsel %vm163_vm6, %v153_v12, %v156_v20 }
  0x32   :  { %v86_v28 = vsel %vm84_vm8, %v85_v21, %v403_v10  ;;  %v168_v22 = vsel %vm166_vm10, %v156_v20, 2102212464  ;;  %v172_v29 = vsel %vm166_vm10, %v159_v25, 920167782  ;;  %v176_v34 = vsel %vm166_vm10, %v162_v26, 1326507024 }
  0x33   :  { %v87_v31 = vadd.s32 %v86_v28, %v82_v19  ;;  %v169_v32 = vsel %vm165_vm9, %v153_v12, %v168_v22  ;;  %v173_v33 = vsel %vm165_vm9, %v156_v20, %v172_v29  ;;  %v177_v38 = vsel %vm165_vm9, %v159_v25, %v176_v34 }
  0x34   :  { %v170_v35 = vsel %vm164_vm7, %v167_v27, %v169_v32  ;;  %v174_v37 = vsel %vm164_vm7, %v171_v23, %v173_v33  ;;  %v178_v40 = vsel %vm164_vm7, %v175_v30, %v177_v38  ;;  %v83_v59 = vadd.s32 %v402_v9, %v399_v8 }
  0x35   :  { %v88_v39 = vadd.s32 536870912, %v87_v31  ;;  %v420_v41 = vmul.u32.u64.low %v387_v24, %v174_v37  ;;  %v421_v42 = vmul.u32.u64.high %v387_v24, %v174_v37, %v420_v41  ;;  %v186_v46 = vmul.u32 %v387_v24, %v170_v35 }
  0x36   :  { %v424_v43 = vmul.u32.u64.low %v387_v24, %v178_v40  ;;  %v425_v44 = vmul.u32.u64.high %v387_v24, %v178_v40, %v424_v43  ;;  %vm119_vm5 = vweird.f32 %v373_v2  ;;  %vm223_vm9 = vweird.f32 %v375_v3 }
  0x37   :  { %v89_v45 = vshrl.u32 %v88_v39, 30  ;;  %v189_v48 = vadd.s32 1, %v421_v42 }
  0x38   :  { %vm188_vm11 = vc.u32 %v425_v44, %v420_v41  ;;  %v187_v15 = vadd.s32 %v420_v41, %v425_v44 }
  0x39   :  { %v90_v47 = vshll.u32 %v89_v45, 30  ;;  %v190_v36 = vsel %vm188_vm11, %v189_v48, %v421_v42  ;;  %v113_v8 = vsub.s32 4, %v89_v45 }
  0x3a   :  { %v191_v50 = vadd.s32 %v190_v36, %v186_v46 }
  0x3b   :  { %v91_v49 = vsub.s32 %v87_v31, %v90_v47  ;;  %v114_v27 = vsel %vm29_vm14, %v113_v8, %v89_v45 }
  0x3c   :  { %v192_v52 = vadd.s32 536870912, %v191_v50  ;;  %v116_v30 = vsel %vm28_vm15, 0, %v114_v27 }
  0x3d   :  { %v93_v51 = vsub.s32 0, %v91_v49  ;;  %v120_v35 = vadd.s32 3, %v116_v30 }
  0x3e   :  { %v193_v54 = vshrl.u32 %v192_v52, 30 }
  0x3f   :  { %v257_v53 = vmin.u32 %v93_v51, %v91_v49  ;;  %v121_v39 = vand.u32 3, %v120_v35 }
  0x40   :  { %v194_v56 = vshll.u32 %v193_v54, 30  ;;  %v217_v34 = vsub.s32 4, %v193_v54 }
  0x41   :  { %v95_v55 = vclz %v257_v53  ;;  %vm126_vm2 = vcmp.eq.s32.totalorder %v121_v39, 2  ;;  %vm123_vm3 = vcmp.eq.s32.totalorder %v121_v39, 0  ;;  %vm122_vm4 = vcmp.lt.s32.totalorder %v121_v39, 2 }
  0x42   :  { %v195_v58 = vsub.s32 %v191_v50, %v194_v56  ;;  %v218_v38 = vsel %vm133_vm0, %v217_v34, %v193_v54 }
  0x43   :  { %v258_v57 = vadd.s32 4294967294, %v95_v55  ;;  %v220_v42 = vsel %vm132_vm1, 0, %v218_v38 }
  0x44   :  { %v197_v60 = vsub.s32 0, %v195_v58  ;;  %v224_v46 = vadd.s32 3, %v220_v42 }
  0x45   :  { %vm259_vm12 = vcmp.lt.s32.totalorder %v258_v57, 0 }
  0x46   :  { %v98_v24 = vsel %vm259_vm12, 0, %v258_v57  ;;  %v261_v0 = vmin.u32 %v197_v60, %v195_v58  ;;  %v225_v36 = vand.u32 3, %v224_v46 }
  0x47   :  { %v99_v61 = vsub.s32 32, %v98_v24  ;;  %v100_v62 = vshll.u32 %v91_v49, %v98_v24  ;;  %v103_v63 = vsub.s32 4294967266, %v98_v24 }
  0x48   :  { %v199_v7 = vclz %v261_v0  ;;  %vm230_vm6 = vcmp.eq.s32.totalorder %v225_v36, 2  ;;  %vm227_vm7 = vcmp.eq.s32.totalorder %v225_v36, 0  ;;  %vm226_vm8 = vcmp.lt.s32.totalorder %v225_v36, 2 }
  0x49   :  { %v101_v1 = vshrl.u32 %v83_v59, %v99_v61  ;;  %v104_v5 = vadd.s32 127, %v103_v63 }
  0x4a   :  { %v262_v12 = vadd.s32 4294967294, %v199_v7 }
  0x4b   :  { %v102_v10 = vor.u32 %v101_v1, %v100_v62  ;;  %v105_v11 = vshll.u32 %v104_v5, 23 }
  0x4c   :  { %vm263_vm13 = vcmp.lt.s32.totalorder %v262_v12, 0 }
  0x4d   :  { %v106_v13 = vor.u32 4788187, %v105_v11  ;;  %v109_v14 = vcvt.s32.f32 %v102_v10  ;;  %v202_v9 = vsel %vm263_vm13, 0, %v262_v12 }
  0x4e   :  { %v203_v17 = vsub.s32 32, %v202_v9  ;;  %v204_v18 = vshll.u32 %v195_v58, %v202_v9  ;;  %v207_v19 = vsub.s32 4294967266, %v202_v9 }
  0x4f   :  { %v107_v16 = vand.u32 2147483647, %v106_v13 }
  0x50   :  { %v205_v21 = vshrl.u32 %v187_v15, %v203_v17  ;;  %v208_v25 = vadd.s32 127, %v207_v19 }
  0x51   :  { %v110_v20 = vmul.f32 %v109_v14, %v107_v16 }
  0x52   :  { %v206_v23 = vor.u32 %v205_v21, %v204_v18  ;;  %v209_v28 = vshll.u32 %v208_v25, 23 }
  0x53   :  { %v111_v26 = vxor.u32 2147483648, %v110_v20 }
  0x54   :  { %v210_v31 = vor.u32 4788187, %v209_v28  ;;  %v213_v32 = vcvt.s32.f32 %v206_v23 }
  0x55   :  { %v112_v22 = vsel %vm29_vm14, %v111_v26, %v110_v20 }
  0x56   :  { %v115_v29 = vsel %vm28_vm15, %v373_v2, %v112_v22  ;;  %v211_v33 = vand.u32 2147483647, %v210_v31 }
  0x57   :  { %282 = vcosq.f32 %v115_v29 }
  0x58   :  { %284 = vsinq.f32 %v115_v29  ;;  %v214_v37 = vmul.f32 %v213_v32, %v211_v33 }
  0x5a   :  { %v215_v4 = vxor.u32 2147483648, %v214_v37 }
  0x5c   :  { %v216_v40 = vsel %vm133_vm0, %v215_v4, %v214_v37 }
  0x5d   :  { %v219_v41 = vsel %vm132_vm1, %v375_v3, %v216_v40 }
  0x5e   :  { %286 = vcosq.f32 %v219_v41 }
  0x5f   :  { %288 = vsinq.f32 %v219_v41 }
  0x61   :  { %v283_v43 = vpop.eup %282 }
  0x62   :  { %v285_v44 = vpop.eup %284  ;;  %v127_v45 = vxor.u32 2147483648, %v283_v43 }
  0x63   :  { %v124_v47 = vxor.u32 2147483648, %v285_v44 }
  0x64   :  { %v128_v6 = vsel %vm126_vm2, %v127_v45, %v285_v44 }
  0x65   :  { %v125_v48 = vsel %vm123_vm3, %v283_v43, %v124_v47 }
  0x66   :  { %v129_v49 = vsel %vm122_vm4, %v125_v48, %v128_v6 }
  0x67   :  { %v130_v50 = vsel %vm119_vm5, nan, %v129_v49 }
  0x68   :  { %v235_v51 = vmul.f32 1.4142135, %v130_v50  ;;  %v287_v52 = vpop.eup %286 }
  0x69   :  { %v289_v53 = vpop.eup %288  ;;  %v231_v54 = vxor.u32 2147483648, %v287_v52 }
  0x6a   :  { %237 = vst [vmem:[#allocation5] sm:$0xff] %v235_v51  ;;  %v228_v55 = vxor.u32 2147483648, %v289_v53 }
  0x6b   :  { %v232_v56 = vsel %vm230_vm6, %v231_v54, %v289_v53 }
  0x6c   :  { %v229_v57 = vsel %vm227_vm7, %v287_v52, %v228_v55 }
  0x6d   :  { %v233_v2 = vsel %vm226_vm8, %v229_v57, %v232_v56 }
  0x6e   :  { %v234_v58 = vsel %vm223_vm9, nan, %v233_v2 }
  0x6f   :  { %v236_v59 = vmul.f32 1.4142135, %v234_v58 }
  0x71   :  { %238 = vst [vmem:[#allocation5 + $0x8] sm:$0xff] %v236_v59 }
  0x72   :  { %323 = shalt.err (!%p320_p12)
}
  0x73   :  { %s324_s24 = scalar_lea.hbm %s459_s1, 256 }
  0x74   :  { %p325_p13 = scmp.ne.s32.totalorder %s459_s1, %s324_s24  ;;  %p328_p0 = scmp.lt.u32.totalorder %s324_s24, %s459_s1 }
  0x76   :  { %p330_p1 = pnand %p328_p0, %p325_p13 }
  0x78   :  { %333 = shalt.err (!%p330_p1)
}
  0x79   :  { %250 = dma.vmem_to_hbm [thread:$0]  %s245_s20, 256, %s459_s1, [#allocation4], %s339_s16, %s339_s16, %s340_s17  }
  0x7a   :  { %336 = dma.done.wait [#allocation4], 256  }
  0x7b   :  { %337 = vsyncadd [#allocation4], 4294967040 }
  0x7c   :  { %254 = vsyncpa [#allocation3], 1 }
  0x7d   :  { %255 = vsyncpa [#allocation4], 1 }

</bundles_post_ra>
